<compile_context>
chip_gen: v6e
topology: v6e:2x2x1
jax: 0.10.0
libtpu: 0.0.40
codegen_flags: <defaults>
</compile_context>

<pallas_src>
import jax
import jax.numpy as jnp
from jax.experimental import pallas as pl
from jax.experimental.pallas import tpu as pltpu


def _chroma_subsample_kernel(x_ref, scb_ref, scr_ref, cb_ref, cr_ref):
    # x_ref : (1, TH2, 2, 6*TW2)  -- row pairs of the RGB-interleaved image slab
    # scb_ref/scr_ref : (6*TW2, TW2) 0.25-one-hot pooling/selection matrices
    # cb_ref/cr_ref : (1, TH2, TW2)
    even = x_ref[0, :, 0, :]          # image rows 2i   -> (TH2, 6*TW2)
    odd = x_ref[0, :, 1, :]           # image rows 2i+1 -> (TH2, 6*TW2)
    v = even + odd                    # vertical half of the 2x2 sum (VPU add)

    # horizontal pair-sum + channel de-interleave + /4, fused in one matmul
    cb = jnp.dot(v, scb_ref[...], preferred_element_type=jnp.float32)
    cr = jnp.dot(v, scr_ref[...], preferred_element_type=jnp.float32)
    cb_ref[0] = cb.astype(cb_ref.dtype)
    cr_ref[0] = cr.astype(cr_ref.dtype)


def _pick_row_tile(h2):
    # tile over pooled rows: multiple of 8 keeps the (TH2, TW2) output block
    # sublane-aligned; fall back to the full extent for small/odd heights.
    for t in (64, 32, 16, 8):
        if h2 % t == 0:
            return t
    return h2


def _pick_col_tile(w2):
    # tile over pooled columns: multiples of 128 keep both the interleaved
    # input block (6*TW2 lanes) and the output block lane-aligned; otherwise
    # take the full extent (block == full dim is always legal).
    for t in (256, 128):
        if w2 % t == 0:
            return t
    return w2


def _pool_matrix(tw2, channel, dtype):
    # S[k, j] = 0.25 iff interleaved lane k (pixel k//3, channel k%3) feeds
    # pooled output pixel j, i.e. k%3 == channel and k//6 == j.
    k = jnp.arange(6 * tw2)
    j = jnp.arange(tw2)
    hit = (k[:, None] % 3 == channel) & (k[:, None] // 6 == j[None, :])
    return jnp.where(hit, 0.25, 0.0).astype(dtype)


def chroma_subsampling(image):
    """image: (B, H, W, 3) -> (y (B,H,W), cb (B,H/2,W/2), cr (B,H/2,W/2))."""
    B, H, W, C = image.shape
    assert C == 3, "expected a (B, H, W, 3) image"
    assert H % 2 == 0 and W % 2 == 0, "H and W must be even for 2x2 pooling"
    H2, W2 = H // 2, W // 2

    # y is a pure strided view in torch -> plain XLA slice here (no compute).
    y = image[:, :, :, 0]

    # Free reshape: expose row pairs; lanes stay RGB-interleaved (lane-dense).
    x = image.reshape(B, H2, 2, 3 * W)

    th2 = _pick_row_tile(H2)
    tw2 = _pick_col_tile(W2)

    s_cb = _pool_matrix(tw2, 1, image.dtype)
    s_cr = _pool_matrix(tw2, 2, image.dtype)

    grid = (B, H2 // th2, W2 // tw2)

    itemsize = jnp.dtype(image.dtype).itemsize
    flops = 2 * (2 * B * H2 * W2) * (6 * tw2)          # two skinny matmuls
    bytes_accessed = (B * H2 * 2 * 3 * W                # interleaved image read
                      + 2 * 6 * tw2 * tw2               # pooling matrices
                      + 2 * B * H2 * W2) * itemsize     # cb + cr writes

    cb, cr = pl.pallas_call(
        _chroma_subsample_kernel,
        out_shape=(
            jax.ShapeDtypeStruct((B, H2, W2), image.dtype),
            jax.ShapeDtypeStruct((B, H2, W2), image.dtype),
        ),
        grid=grid,
        in_specs=[
            pl.BlockSpec((1, th2, 2, 6 * tw2), lambda b, h, w: (b, h, 0, w)),
            pl.BlockSpec((6 * tw2, tw2), lambda b, h, w: (0, 0)),
            pl.BlockSpec((6 * tw2, tw2), lambda b, h, w: (0, 0)),
        ],
        out_specs=(
            pl.BlockSpec((1, th2, tw2), lambda b, h, w: (b, h, w)),
            pl.BlockSpec((1, th2, tw2), lambda b, h, w: (b, h, w)),
        ),
        compiler_params=pltpu.CompilerParams(
            dimension_semantics=("parallel", "parallel", "parallel"),
            vmem_limit_bytes=48 * 1024 * 1024,
        ),
        cost_estimate=pl.CostEstimate(
            flops=flops, transcendentals=0, bytes_accessed=bytes_accessed),
    )(x, s_cb, s_cr)

    return y, cb, cr


def _reference(image):
    # pure-JAX reference of the torch forward
    y = image[..., 0]

    def pool(c):
        return 0.25 * (c[:, 0::2, 0::2] + c[:, 0::2, 1::2]
                       + c[:, 1::2, 0::2] + c[:, 1::2, 1::2])

    return y, pool(image[..., 1]), pool(image[..., 2])


if __name__ == "__main__":
    # Module has no learnable parameters (empty __init__), nothing to init.
    B, H, W = 2, 16, 16
    key = jax.random.PRNGKey(0)
    image = jax.random.uniform(key, (B, H, W, 3), dtype=jnp.float32)

    fn = jax.jit(chroma_subsampling)
    y, cb, cr = jax.block_until_ready(fn(image))

    y_ref, cb_ref, cr_ref = _reference(image)

    assert y.shape == (B, H, W), y.shape
    assert cb.shape == (B, H // 2, W // 2), cb.shape
    assert cr.shape == (B, H // 2, W // 2), cr.shape
    assert y.dtype == image.dtype and cb.dtype == image.dtype and cr.dtype == image.dtype
    assert jnp.allclose(y, y_ref, atol=1e-6, rtol=1e-6)
    assert jnp.allclose(cb, cb_ref, atol=1e-5, rtol=1e-5)
    assert jnp.allclose(cr, cr_ref, atol=1e-5, rtol=1e-5)
    print("KERNEL_OK")
</pallas_src>

<mosaic_0001>
module attributes {stable_mosaic.version = 11 : i64} {
  func.func @_chroma_subsample_kernel(%arg0: i32, %arg1: i32, %arg2: i32, %arg3: memref<1x8x2x48xf32, #tpu.memory_space<vmem>>, %arg4: memref<48x8xf32, #tpu.memory_space<vmem>>, %arg5: memref<48x8xf32, #tpu.memory_space<vmem>>, %arg6: memref<1x8x8xf32, #tpu.memory_space<vmem>>, %arg7: memref<1x8x8xf32, #tpu.memory_space<vmem>>) attributes {dimension_semantics = [#tpu.dimension_semantics<parallel>, #tpu.dimension_semantics<parallel>, #tpu.dimension_semantics<parallel>], iteration_bounds = array<i64: 2, 1, 1>, scalar_prefetch = 0 : i64, scratch_operands = 0 : i64, tpu.core_type = #tpu.core_type<tc>, window_params = [{transform_indices = @transform_0, window_bounds = array<i64: 1, 8, 2, 48>}, {pipeline_mode = #tpu.pipeline_mode<synchronous>, transform_indices = @transform_1, window_bounds = array<i64: 48, 8>}, {pipeline_mode = #tpu.pipeline_mode<synchronous>, transform_indices = @transform_2, window_bounds = array<i64: 48, 8>}, {transform_indices = @transform_3, window_bounds = array<i64: 1, 8, 8>}, {transform_indices = @transform_4, window_bounds = array<i64: 1, 8, 8>}]} {
    %c0 = arith.constant 0 : index
    %c0_0 = arith.constant 0 : index
    %c0_1 = arith.constant 0 : index
    %c0_2 = arith.constant 0 : index
    %0 = vector.load %arg3[%c0, %c0_0, %c0_1, %c0_2] : memref<1x8x2x48xf32, #tpu.memory_space<vmem>>, vector<1x8x1x48xf32>
    %1 = vector.shape_cast %0 : vector<1x8x1x48xf32> to vector<8x48xf32>
    %c0_3 = arith.constant 0 : index
    %c0_4 = arith.constant 0 : index
    %c1 = arith.constant 1 : index
    %c0_5 = arith.constant 0 : index
    %2 = vector.load %arg3[%c0_3, %c0_4, %c1, %c0_5] : memref<1x8x2x48xf32, #tpu.memory_space<vmem>>, vector<1x8x1x48xf32>
    %3 = vector.shape_cast %2 : vector<1x8x1x48xf32> to vector<8x48xf32>
    %4 = arith.addf %1, %3 : vector<8x48xf32>
    %c0_6 = arith.constant 0 : index
    %c0_7 = arith.constant 0 : index
    %5 = vector.load %arg4[%c0_6, %c0_7] : memref<48x8xf32, #tpu.memory_space<vmem>>, vector<48x8xf32>
    %cst = arith.constant dense<0.000000e+00> : vector<8x8xf32>
    %6 = tpu.matmul %4, %5, %cst {dimension_numbers = #tpu.dot_dimension_numbers<[1], [0], [0], [1], [0, 0, 1, 1], [], []>} : vector<8x48xf32>, vector<48x8xf32>, vector<8x8xf32> -> vector<8x8xf32>
    %c0_8 = arith.constant 0 : index
    %c0_9 = arith.constant 0 : index
    %7 = vector.load %arg5[%c0_8, %c0_9] : memref<48x8xf32, #tpu.memory_space<vmem>>, vector<48x8xf32>
    %cst_10 = arith.constant dense<0.000000e+00> : vector<8x8xf32>
    %8 = tpu.matmul %4, %7, %cst_10 {dimension_numbers = #tpu.dot_dimension_numbers<[1], [0], [0], [1], [0, 0, 1, 1], [], []>} : vector<8x48xf32>, vector<48x8xf32>, vector<8x8xf32> -> vector<8x8xf32>
    %c0_11 = arith.constant 0 : index
    %c0_12 = arith.constant 0 : index
    %c0_13 = arith.constant 0 : index
    %9 = vector.load %arg6[%c0_11, %c0_12, %c0_13] : memref<1x8x8xf32, #tpu.memory_space<vmem>>, vector<1x8x8xf32>
    %10 = vector.shape_cast %9 : vector<1x8x8xf32> to vector<8x8xf32>
    %11 = vector.shape_cast %6 : vector<8x8xf32> to vector<1x8x8xf32>
    tpu.vector_store %arg6[%c0_11, %c0_12, %c0_13], %11 {strides = array<i32>} : memref<1x8x8xf32, #tpu.memory_space<vmem>>, vector<1x8x8xf32>,
    %c0_14 = arith.constant 0 : index
    %c0_15 = arith.constant 0 : index
    %c0_16 = arith.constant 0 : index
    %12 = vector.load %arg7[%c0_14, %c0_15, %c0_16] : memref<1x8x8xf32, #tpu.memory_space<vmem>>, vector<1x8x8xf32>
    %13 = vector.shape_cast %12 : vector<1x8x8xf32> to vector<8x8xf32>
    %14 = vector.shape_cast %8 : vector<8x8xf32> to vector<1x8x8xf32>
    tpu.vector_store %arg7[%c0_14, %c0_15, %c0_16], %14 {strides = array<i32>} : memref<1x8x8xf32, #tpu.memory_space<vmem>>, vector<1x8x8xf32>,
    return
  }
  func.func @transform_0(%arg0: i32, %arg1: i32, %arg2: i32) -> (i32, i32, i32, i32) {
    %c0_i32 = arith.constant 0 : i32
    %c0_i32_0 = arith.constant 0 : i32
    return %arg0, %arg1, %c0_i32, %arg2 : i32, i32, i32, i32
  }
  func.func @transform_1(%arg0: i32, %arg1: i32, %arg2: i32) -> (i32, i32) {
    %c0_i32 = arith.constant 0 : i32
    %c0_i32_0 = arith.constant 0 : i32
    %c0_i32_1 = arith.constant 0 : i32
    return %c0_i32, %c0_i32_0 : i32, i32
  }
  func.func @transform_2(%arg0: i32, %arg1: i32, %arg2: i32) -> (i32, i32) {
    %c0_i32 = arith.constant 0 : i32
    %c0_i32_0 = arith.constant 0 : i32
    %c0_i32_1 = arith.constant 0 : i32
    return %c0_i32, %c0_i32_0 : i32, i32
  }
  func.func @transform_3(%arg0: i32, %arg1: i32, %arg2: i32) -> (i32, i32, i32) {
    %c0_i32 = arith.constant 0 : i32
    return %arg0, %arg1, %arg2 : i32, i32, i32
  }
  func.func @transform_4(%arg0: i32, %arg1: i32, %arg2: i32) -> (i32, i32, i32) {
    %c0_i32 = arith.constant 0 : i32
    return %arg0, %arg1, %arg2 : i32, i32, i32
  }
}

</mosaic_0001>

<bundles_post_ra>
// kernel: chroma_subsampling.1
= control target key start
LH: loop header
LB: loop body
LE: loop exit
PB: predicated region body
PF: predicated region fallthrough
CT: control target
= control target key end

     0   :  { %10 = vsyncpa [#allocation3], 0  ;;  %s1096_s0 = inlined_call_operand.vmem [shape: f32[2,8,2,48], index: 0, kind: input, shape index: {}]   ;;  %s1097_s1 = inlined_call_operand.vmem [shape: f32[48,8], index: 1, kind: input, shape index: {}]   ;;  %s1098_s2 = inlined_call_operand.vmem [shape: f32[48,8], index: 2, kind: input, shape index: {}]   ;;  %s1099_s3 = inlined_call_operand.hbm [shape: f32[2,8,8], index: 3, kind: output, shape index: {0}]   ;;  %s1100_s4 = inlined_call_operand.hbm [shape: f32[2,8,8], index: 4, kind: output, shape index: {1}]  }
   0x1   :  { %12 = vsyncpa [#allocation3 + $0x1], 0 }
   0x2   :  { %13 = vsyncpa [#allocation5], 0 }
   0x3   :  { %15 = vsyncpa [#allocation5 + $0x1], 0  ;;  %s884_s15 = smov 0   ;;  %s886_s16 = smov 0  }
   0x4   :  { %s888_s17 = smov 0   ;;  %s890_s18 = smov 0  }
   0x5   :  { %s892_s19 = smov 0   ;;  %s894_s20 = smov 0  }
   0x6 LB: > { %s623_s21 = sadd.s32 4294967295, %s853_s20   ;;  %s624_s22 = sadd.s32 4294967294, %s853_s20   ;;  %s853_s20 = sphi %s894_s20, %s21_s20   ;;  %s849_s19 = sphi %s892_s19, %s1107_s19   ;;  %s845_s18 = sphi %s890_s18, %s1106_s18   ;;  %s841_s17 = sphi %s888_s17, %s1105_s17   ;;  %s837_s16 = sphi %s886_s16, %s1104_s16   ;;  %s833_s15 = sphi %s884_s15, %s1103_s15  }
   0x7   : > { %s40_s23 = sadd.s32 1, %s849_s19  ;;  %s123_s24 = sadd.s32 1, %s841_s17 }
   0x8   : > { %p42_p0 = scmp.ge.s32.totalorder %s40_s23, 2  ;;  %p133_p1 = scmp.ne.s32.totalorder %s841_s17, %s837_s16 }
   0x9   : > { %p134_p2 = scmp.eq.s32.totalorder %s623_s21, 1  ;;  %p139_p3 = scmp.ne.s32.totalorder %s837_s16, %s833_s15 }
   0xa   : > { %s1109_s23 = smov (%p42_p0, %s40_s23), 0  ;;  %p140_p5 = scmp.eq.s32.totalorder %s624_s22, 1 }
   0xb   : > { %p924_p4 = por %p134_p2, %p133_p1  ;;  %s116_s26 = ssub.s32 %s849_s19, %s1109_s23 }
   0xc   : > { %p627_p6 = scmp.ge.s32.totalorder %s853_s20, 1  ;;  %p121_p7 = scmp.eq.s32.totalorder %s116_s26, 0 }
   0xd   : > { %p931_p8 = por %p140_p5, %p139_p3  ;;  %p210_p9 = scmp.lt.s32.totalorder %s853_s20, 3 }
   0xe   : > { %s937_s28 = scalar_select %p121_p7, %s841_s17, %s123_s24  }
   0xf   : > { %p211_p10 = pnand %p627_p6, %p210_p9 }
  0x10   : > { %p249_p11 = scmp.lt.s32.totalorder (!%p211_p10), %s845_s18, 1  ;;  %s1014_s22 = sand.u32 (!%p211_p10), 1, %s837_s16  }
  0x11   : > { %214 = sbr.rel (%p211_p10) target bundleno = 270 (0x10e), region = 32  ;;  %s628_s24 = sshll.u32 (!%p211_p10), %s1014_s22, 3 }
  0x12   : > { %s240_s29 = scalar_lea.vmem (!%p211_p10), [#allocation2], %s628_s24  ;;  %s247_s5 = scalar_lea.vmem (!%p211_p10), [#allocation4], %s628_s24 }
  0x13   : > { %s493_s30 = sshll.u32 (!%p211_p10), %s240_s29, 4  ;;  %s508_s6 = sshll.u32 (!%p211_p10), %s247_s5, 4  ;;  %s1023_s30 = int_to_ptr.vmem [resolvable:$true] %s493_s30  ;;  %s1030_s6 = int_to_ptr.vmem [resolvable:$true] %s508_s6 }
  0x14   : > { %s473_s12 = scalar_lea.sflag (!%p211_p10), [#allocation3], %s1014_s22  ;;  %s747_s13 = scalar_lea.vmem (!%p211_p10), %s1023_s30, 128 }
  0x15   : > { %p748_p12 = scmp.ne.s32.totalorder (!%p211_p10), %s1023_s30, %s747_s13  ;;  %s857_s14 = smov (!%p211_p10), [#allocation2]  }
  0x16   : > { %v290_v0 = vld [vmem:[%s1097_s1 + $0x28] sm:$0xff]  ;;  %v855_v2 = vmov 0.0   ;;  %v289_v3 = vld [vmem:[%s1097_s1 + $0x20] sm:$0xff]  ;;  %s250_s11 = scalar_select %p249_p11, %s845_s18, 1  ;;  %v288_v5 = vld [vmem:[%s1097_s1 + $0x18] sm:$0xff]  ;;  %vm300_vm0 = vcmask 1041409  }
  0x17   : > { %v398_v1 = vld [vmem:[%s1098_s2 + $0x28] sm:$0xff]  ;;  %655 = vmatprep.subr.mxu0 %v855_v2  ;;  %670 = vmatprep.subr.mxu1 %v855_v2  ;;  %v397_v4 = vld [vmem:[%s1098_s2 + $0x20] sm:$0xff]  ;;  %v396_v6 = vld [vmem:[%s1098_s2 + $0x18] sm:$0xff]  ;;  %vm303_vm1 = vcmask 1042434   ;;  %vm856_vm2 = vmmov 0   ;;  %vm306_vm3 = vcmask 1043459   ;;  %p749_p13 = pnand %p748_p12, %p924_p4 }
  0x18   : > { %656 = vmatpush3.msra.mxu0 %v290_v0  ;;  %671 = vmatpush3.msra.mxu1 %v398_v1  ;;  %v287_v7 = vld [vmem:[%s1097_s1 + $0x10] sm:$0xff]  ;;  %s640_s26 = sshll.u32 %s250_s11, 4  ;;  %v286_v9 = vld [vmem:[%s1097_s1 + $0x8] sm:$0xff]  ;;  %v285_v14 = vld [vmem:[%s1097_s1] sm:$0xff]  ;;  %vm309_vm4 = vcmask 1044484   ;;  %vm312_vm5 = vcmask 1045509  }
  0x19   : > { %657 = vmatprep.subr.mxu0 %v855_v2  ;;  %672 = vmatprep.subr.mxu1 %v855_v2  ;;  %v395_v8 = vld [vmem:[%s1098_s2 + $0x10] sm:$0xff]  ;;  %v394_v10 = vld [vmem:[%s1098_s2 + $0x8] sm:$0xff]  ;;  %s980_s11 = scalar_lea.vmem %s1096_s0, %s640_s26  ;;  %v393_v18 = vld [vmem:[%s1098_s2] sm:$0xff]  ;;  %vm315_vm6 = vcmask 1046534   ;;  %vm318_vm7 = vcmask 1047559   ;;  %vm320_vm8 = vcmask 392192   ;;  %p750_p0 = pneg %p749_p13 }
  0x1a   : > { %658 = vmatpush3.msra.mxu0 %v289_v3  ;;  %673 = vmatpush3.msra.mxu1 %v397_v4  ;;  %v261_v11 = vld [vmem:[%s980_s11] sm:$0x1]  ;;  %v262_v12 = vld [vmem:[%s980_s11 + $0x2] sm:$0x1]  ;;  %v263_v13 = vld [vmem:[%s980_s11 + $0x4] sm:$0x1] }
  0x1b   : > { %659 = vmatprep.subr.mxu0 %v855_v2  ;;  %674 = vmatprep.subr.mxu1 %v855_v2  ;;  %v264_v15 = vld [vmem:[%s980_s11 + $0x6] sm:$0x1]  ;;  %v265_v16 = vld [vmem:[%s980_s11 + $0x8] sm:$0x1]  ;;  %v266_v17 = vld [vmem:[%s980_s11 + $0xa] sm:$0x1] }
  0x1c   : > { %660 = vmatpush3.msra.mxu0 %v288_v5  ;;  %675 = vmatpush3.msra.mxu1 %v396_v6  ;;  %v267_v19 = vld [vmem:[%s980_s11 + $0xc] sm:$0x1]  ;;  %v268_v20 = vld [vmem:[%s980_s11 + $0xe] sm:$0x1]  ;;  %v269_v21 = vld [vmem:[%s980_s11 + $0x1] sm:$0x1] }
  0x1d   : > { %661 = vmatprep.subr.mxu0 %v855_v2  ;;  %676 = vmatprep.subr.mxu1 %v855_v2  ;;  %v270_v22 = vld [vmem:[%s980_s11 + $0x3] sm:$0x1]  ;;  %v271_v23 = vld [vmem:[%s980_s11 + $0x5] sm:$0x1]  ;;  %v272_v24 = vld [vmem:[%s980_s11 + $0x7] sm:$0x1]  ;;  %v277_v25 = vadd.f32 %v269_v21, %v261_v11 }
  0x1e   : > { %662 = vmatpush3.msra.mxu0 %v287_v7  ;;  %677 = vmatpush3.msra.mxu1 %v395_v8  ;;  %v273_v26 = vld [vmem:[%s980_s11 + $0x9] sm:$0x1]  ;;  %v274_v27 = vld [vmem:[%s980_s11 + $0xb] sm:$0x1]  ;;  %v275_v28 = vld [vmem:[%s980_s11 + $0xd] sm:$0x1]  ;;  %v278_v29 = vadd.f32 %v270_v22, %v262_v12  ;;  %v279_v30 = vadd.f32 %v271_v23, %v263_v13  ;;  %v280_v31 = vadd.f32 %v272_v24, %v264_v15 }
  0x1f   : > { %663 = vmatprep.subr.mxu0 %v855_v2  ;;  %678 = vmatprep.subr.mxu1 %v855_v2  ;;  %v276_v32 = vld [vmem:[%s980_s11 + $0xf] sm:$0x1]  ;;  %v281_v33 = vadd.f32 %v273_v26, %v265_v16  ;;  %v282_v34 = vadd.f32 %v274_v27, %v266_v17  ;;  %v283_v35 = vadd.f32 %v275_v28, %v267_v19  ;;  %s636_s26 = sshll.u32 %s845_s18, 7  ;;  %vm469_vm9 = vcmask 64512   ;;  %s751_s21 = sshll.u32 %s857_s14, 4  ;;  %s752_s21 = int_to_ptr.vmem [resolvable:$false] %s751_s21 }
  0x20   : > { %664 = vmatpush3.msra.mxu0 %v286_v9  ;;  %679 = vmatpush3.msra.mxu1 %v394_v10  ;;  %v284_v36 = vadd.f32 %v276_v32, %v268_v20  ;;  %v299_v37 = vrot.slane %v278_v29, 7  ;;  %v302_v38 = vrot.slane %v279_v30, 6  ;;  %v305_v39 = vrot.slane %v280_v31, 5  ;;  %s1021_s9 = scalar_lea.hbm %s1099_s3, %s636_s26  ;;  %s1028_s11 = scalar_lea.hbm %s1100_s4, %s636_s26 }
  0x21   : > { %665 = vmatprep.subr.mxu0 %v855_v2  ;;  %680 = vmatprep.subr.mxu1 %v855_v2  ;;  %v308_v40 = vrot.slane %v281_v33, 4  ;;  %v311_v42 = vrot.slane %v282_v34, 3  ;;  %v314_v44 = vrot.slane %v283_v35, 2  ;;  %s753_s24 = scalar_lea.vmem %s752_s21, 256  ;;  %p754_p1 = scmp.lt.s32.totalorder %s1023_s30, %s752_s21 }
  0x22   : > { %666 = vmatpush3.msra.mxu0 %v285_v14  ;;  %667 = vmatprep.mubr.msk.f32.mxu0 %vm856_vm2, %v855_v2  ;;  %v301_v41 = vsel %vm300_vm0, %v299_v37, %v277_v25  ;;  %v317_v46 = vrot.slane %v284_v36, 1  ;;  %p755_p2 = scmp.lt.s32.totalorder %s753_s24, %s747_s13 }
  0x23   : > { %681 = vmatpush3.msra.mxu1 %v393_v18  ;;  %682 = vmatprep.mubr.msk.f32.mxu1 %vm856_vm2, %v855_v2  ;;  %v304_v43 = vsel %vm303_vm1, %v302_v38, %v301_v41 }
  0x24   : > { %v307_v45 = vsel %vm306_vm3, %v305_v39, %v304_v43  ;;  %p756_p3 = por %p755_p2, %p754_p1 }
  0x25   : > { %v310_v47 = vsel %vm309_vm4, %v308_v40, %v307_v45 }
  0x26   : > { %v313_v48 = vsel %vm312_vm5, %v311_v42, %v310_v47  ;;  %p757_p5 = pnand %p756_p3, %p750_p0 }
  0x27   : > { %v316_v49 = vsel %vm315_vm6, %v314_v44, %v313_v48 }
  0x28   : > { %v319_v50 = vsel %vm318_vm7, %v317_v46, %v316_v49 }
  0x29   : > { %668 = vmatmul.mubr.msk.f32.vlgmr.msra.gmra.mxu0 %vm320_vm8, %v319_v50  ;;  %683 = vmatmul.mubr.msk.f32.vlgmr.msra.gmra.mxu1 %vm320_vm8, %v319_v50 }
  0xe9   : > { %v389_v51 = vpop.f32.mrf.mxu0  ;;  %v465_v52 = vpop.f32.mrf.mxu1 }
  0xea   : > { %470 = vst.msk [vmem:[%s240_s29] sm:$0xff] %vm469_vm9, %v389_v51  ;;  %471 = vst.msk [vmem:[%s247_s5] sm:$0xff] %vm469_vm9, %v465_v52 }
  0xeb   : > { %v669_v53 = vpop.f32.mrf.mxu0  ;;  %v684_v54 = vpop.f32.mrf.mxu1 }
  0xec   : > { %760 = shalt.err (!%p757_p5)
}
  0xed   : > { %s761_s26 = scalar_lea.hbm %s1021_s9, 128  ;;  %s765_s7 = scalar_lea.hbm %s1099_s3, 256 }
  0xee   : > { %p762_p6 = scmp.ne.s32.totalorder %s1021_s9, %s761_s26  ;;  %p766_p10 = scmp.lt.s32.totalorder %s1021_s9, %s1099_s3 }
  0xef   : > { %p767_p11 = scmp.lt.s32.totalorder %s765_s7, %s761_s26 }
  0xf0   : > { %p763_p7 = pnand %p762_p6, %p924_p4 }
  0xf1   : > { %p768_p12 = por %p767_p11, %p766_p10 }
  0xf2   : > { %p764_p9 = pneg %p763_p7 }
  0xf4   : > { %p769_p13 = pnand %p768_p12, %p764_p9 }
  0xf6   : > { %772 = shalt.err (!%p769_p13)
}
  0xf7   : > { %685 = dma.vmem_to_hbm [thread:$0]  (%p924_p4), %s1023_s30, 128, %s1021_s9, %s473_s12  }
  0xf8   : > { %s478_s18 = scalar_lea.sflag [#allocation5], %s1014_s22  ;;  %s773_s13 = scalar_lea.vmem %s1030_s6, 128 }
  0xf9   : > { %p774_p0 = scmp.ne.s32.totalorder %s1030_s6, %s773_s13  ;;  %s858_s14 = smov [#allocation4]  }
  0xfa   : > { %s777_s21 = sshll.u32 %s858_s14, 4  ;;  %s778_s21 = int_to_ptr.vmem [resolvable:$false] %s777_s21 }
  0xfb   : > { %p775_p1 = pnand %p774_p0, %p924_p4  ;;  %s779_s24 = scalar_lea.vmem %s778_s21, 256 }
  0xfc   : > { %p780_p3 = scmp.lt.s32.totalorder %s1030_s6, %s778_s21  ;;  %p781_p5 = scmp.lt.s32.totalorder %s779_s24, %s773_s13 }
  0xfd   : > { %p776_p2 = pneg %p775_p1 }
  0xfe   : > { %p782_p6 = por %p781_p5, %p780_p3 }
 0x100   : > { %p783_p7 = pnand %p782_p6, %p776_p2 }
 0x102   : > { %786 = shalt.err (!%p783_p7)
}
 0x103   : > { %s787_s30 = scalar_lea.hbm %s1028_s11, 128  ;;  %s791_s12 = scalar_lea.hbm %s1100_s4, 256 }
 0x104   : > { %p788_p9 = scmp.ne.s32.totalorder %s1028_s11, %s787_s30  ;;  %p792_p12 = scmp.lt.s32.totalorder %s1028_s11, %s1100_s4 }
 0x105   : > { %p793_p13 = scmp.lt.s32.totalorder %s791_s12, %s787_s30 }
 0x106   : > { %p789_p10 = pnand %p788_p9, %p924_p4 }
 0x107   : > { %p794_p0 = por %p793_p13, %p792_p12 }
 0x108   : > { %p790_p11 = pneg %p789_p10 }
 0x10a   : > { %p795_p1 = pnand %p794_p0, %p790_p11 }
 0x10c   : > { %798 = shalt.err (!%p795_p1)
}
 0x10d   : > { %686 = dma.vmem_to_hbm [thread:$0]  (%p924_p4), %s1030_s6, 128, %s1028_s11, %s478_s18  }
 0x10e PF: > { %p696_p2 = scmp.ge.s32.totalorder %s853_s20, 2  ;;  %s520_s5 = sand.u32 1, %s833_s15  }
 0x10f   : > { %s521_s7 = scalar_lea.sflag [#allocation3], %s520_s5 }
 0x110   : > { %p690_p3 = pnand %p696_p2, %p931_p8 }
 0x112   : > { %p691_p5 = pneg %p690_p3 }
 0x114   : > { %824 = dma.done.wait (%p691_p5), %s521_s7, 128  }
 0x115   : > { %826 = vsyncadd (%p691_p5), %s521_s7, 4294967168  ;;  %s530_s8 = scalar_lea.sflag [#allocation5], %s520_s5 }
 0x116   : > { %828 = dma.done.wait (%p691_p5), %s530_s8, 128  }
 0x117   : > { %830 = vsyncadd (%p691_p5), %s530_s8, 4294967168  ;;  %s21_s20 = sadd.s32 1, %s853_s20   ;;  %s1103_s15 = smov %s837_s16 }
 0x118   : > { %p18_p6 = scmp.ge.s32.totalorder %s21_s20, 4   ;;  %s1104_s16 = smov %s841_s17 }
 0x119   : > { %s1105_s17 = smov %s937_s28  ;;  %s1106_s18 = smov %s849_s19 }
 0x11a   : > { %s1107_s19 = smov %s1109_s23  ;;  %20 = sbr.rel (!%p18_p6) target bundleno = 6 (0x6), region = 84 }
 0x11f   :  { %535 = vsyncpa [#allocation3], 1 }
 0x120   :  { %537 = vsyncpa [#allocation3 + $0x1], 1 }
 0x121   :  { %538 = vsyncpa [#allocation5], 1 }
 0x122   :  { %540 = vsyncpa [#allocation5 + $0x1], 1 }

</bundles_post_ra>
